<compile_context>
chip_gen: v7x
topology: tpu7x:2x2x1
jax: 0.10.0
libtpu: 0.0.40
codegen_flags: <defaults>
</compile_context>

<pallas_src>
import numpy as np
import jax
import jax.numpy as jnp
from jax.experimental import pallas as pl
from jax.experimental.pallas import tpu as pltpu


# ----------------------------- host-side weight preparation -----------------------------

def _expand_conv_weight(w_hwio, width):
    """3x3 'same' conv as 3 row-shifted matmuls on (H, W*Cin) row slabs.

    w_hwio: (3, 3, Cin, Cout). Returns (3, width*Cin, width*Cout) banded matrices W_e so that
      out[h, wo*Cout+co] = sum_dh  x_rowpadded[h+dh, :] @ W_e[dh]
    reproduces Conv2d(kernel=3, padding=1) on an (H, width) image flattened to (H, width*Cin).
    """
    w = np.asarray(w_hwio, np.float32)
    cin, cout = w.shape[2], w.shape[3]
    out = np.zeros((3, width * cin, width * cout), np.float32)
    for dh in range(3):
        for wo in range(width):
            for dw in range(3):
                wi = wo + dw - 1
                if 0 <= wi < width:
                    out[dh, wi * cin:(wi + 1) * cin, wo * cout:(wo + 1) * cout] = w[dh, dw]
    return jnp.asarray(out)


def _tile_chan(v, width):
    """Per-channel vector (C,) -> (1, width*C) matching the (w, c) lane flattening."""
    return jnp.asarray(np.tile(np.asarray(v, np.float32), width).reshape(1, -1))


# ----------------------------- Pallas kernels -----------------------------

def _make_down_block_kernel(N, H, W, C1):
    """Fused DownConv body: conv1+ReLU+BN1 -> conv2+ReLU+BN2, all in VMEM (pool done outside)."""
    def kernel(xp_ref, w1_ref, b1_ref, s1_ref, sh1_ref,
               w2_ref, b2_ref, s2_ref, sh2_ref, o_ref, pad_ref):
        # zero the row-padding scratch once; interior rows are fully overwritten per image
        pad_ref[...] = jnp.zeros(pad_ref.shape, jnp.float32)
        for n in range(N):                              # N is tiny & static -> unrolled
            acc = jnp.zeros((H, W * C1), jnp.float32)
            for dh in range(3):
                acc += jnp.dot(xp_ref[n, dh:dh + H, :], w1_ref[dh],
                               preferred_element_type=jnp.float32)
            y1 = jnp.maximum(acc + b1_ref[...], 0.0) * s1_ref[...] + sh1_ref[...]
            pad_ref[1:H + 1, :] = y1                    # conv1 activation stays in VMEM
            acc2 = jnp.zeros((H, W * C1), jnp.float32)
            for dh in range(3):
                acc2 += jnp.dot(pad_ref[dh:dh + H, :], w2_ref[dh],
                                preferred_element_type=jnp.float32)
            y2 = jnp.maximum(acc2 + b2_ref[...], 0.0) * s2_ref[...] + sh2_ref[...]
            o_ref[n * H:(n + 1) * H, :] = y2
    return kernel


def _make_up_block_kernel(N, H, W, C1, C2, fuse_linear):
    """Fused UpConv body: conv1+ReLU+BN1 -> [concat w/ skip folded into split weights]
    -> conv2+ReLU+BN2 -> (optional) fused 1x1-conv + ReLU."""
    def kernel(*refs):
        if fuse_linear:
            (xp_ref, sk_ref, w1_ref, b1_ref, s1_ref, sh1_ref,
             w2a_ref, w2b_ref, b2_ref, s2_ref, sh2_ref,
             wl_ref, bl_ref, o_ref, pad_ref) = refs
        else:
            (xp_ref, sk_ref, w1_ref, b1_ref, s1_ref, sh1_ref,
             w2a_ref, w2b_ref, b2_ref, s2_ref, sh2_ref,
             o_ref, pad_ref) = refs
        pad_ref[...] = jnp.zeros(pad_ref.shape, jnp.float32)
        for n in range(N):
            acc = jnp.zeros((H, W * C1), jnp.float32)
            for dh in range(3):
                acc += jnp.dot(xp_ref[n, dh:dh + H, :], w1_ref[dh],
                               preferred_element_type=jnp.float32)
            y1 = jnp.maximum(acc + b1_ref[...], 0.0) * s1_ref[...] + sh1_ref[...]
            pad_ref[1:H + 1, :] = y1
            acc2 = jnp.zeros((H, W * C2), jnp.float32)
            for dh in range(3):
                # conv2 weight split: first C1 in-channels act on conv1 output, rest on the skip
                acc2 += jnp.dot(pad_ref[dh:dh + H, :], w2a_ref[dh],
                                preferred_element_type=jnp.float32)
                acc2 += jnp.dot(sk_ref[n, dh:dh + H, :], w2b_ref[dh],
                                preferred_element_type=jnp.float32)
            y2 = jnp.maximum(acc2 + b2_ref[...], 0.0) * s2_ref[...] + sh2_ref[...]
            if fuse_linear:
                y2 = jnp.maximum(jnp.dot(y2, wl_ref[...],
                                         preferred_element_type=jnp.float32) + bl_ref[...], 0.0)
            o_ref[n * H:(n + 1) * H, :] = y2
    return kernel


def _linear_relu_kernel(x_ref, w_ref, b_ref, o_ref):
    """relu(x @ w + b) -- only used on the general (non-canonical node_type) fallback path."""
    o_ref[...] = jnp.maximum(
        jnp.dot(x_ref[...], w_ref[...], preferred_element_type=jnp.float32) + b_ref[...], 0.0)


def _classifier_kernel(h_ref, w1_ref, b1_ref, w2_ref, b2_ref, w3_ref, b3_ref, o_ref):
    """All node-classifier heads at once via block-diagonal weights; output is (M, num_heads)."""
    z = jnp.maximum(jnp.dot(h_ref[...], w1_ref[...],
                            preferred_element_type=jnp.float32) + b1_ref[...], 0.0)
    z = jnp.maximum(jnp.dot(z, w2_ref[...],
                            preferred_element_type=jnp.float32) + b2_ref[...], 0.0)
    z = jnp.dot(z, w3_ref[...], preferred_element_type=jnp.float32) + b3_ref[...]
    o_ref[...] = pl.reciprocal(1.0 + jnp.exp(-z), approx=True)   # sigmoid on the EUP slot


# ----------------------------- block wrappers (one pallas_call each) -----------------------------

def down_block(x_nhwc, p):
    N, H, W, Cin = x_nhwc.shape
    assert H == p["spatial"] and W == p["spatial"]
    C1 = p["cout"]
    xr = jnp.pad(x_nhwc.reshape(N, H, W * Cin), ((0, 0), (1, 1), (0, 0)))   # row padding only
    y = pl.pallas_call(
        _make_down_block_kernel(N, H, W, C1),
        out_shape=jax.ShapeDtypeStruct((N * H, W * C1), jnp.float32),
        scratch_shapes=[pltpu.VMEM((H + 2, W * C1), jnp.float32)],
    )(xr, p["w1e"], p["b1"], p["s1"], p["sh1"], p["w2e"], p["b2"], p["s2"], p["sh2"])
    y = y.reshape(N, H, W, C1)
    # nn.AdaptiveMaxPool2d with integer ratio == non-overlapping window max (tiny XLA glue)
    Ho = Wo = p["out_size"]
    fh, fw = H // Ho, W // Wo
    return y.reshape(N, Ho, fh, Wo, fw, C1).max(axis=(2, 4))


def upsample_nearest(x, out_size):
    # nn.Upsample(size=out_size), default mode='nearest', integer scale factor.
    N, H, W, C = x.shape
    assert out_size % H == 0 and out_size % W == 0
    return jnp.repeat(jnp.repeat(x, out_size // H, axis=1), out_size // W, axis=2)


def up_block(x_nhwc, skip_nhwc, p, lin=None):
    N = x_nhwc.shape[0]
    H = W = p["out_size"]
    C1 = C2 = p["cout"]
    xu = upsample_nearest(x_nhwc, H)
    Cin, Cs = xu.shape[-1], skip_nhwc.shape[-1]
    xr = jnp.pad(xu.reshape(N, H, W * Cin), ((0, 0), (1, 1), (0, 0)))
    sr = jnp.pad(skip_nhwc.reshape(N, H, W * Cs), ((0, 0), (1, 1), (0, 0)))
    cout_lane = (lin["we"].shape[1] // W) if lin is not None else C2
    args = [xr, sr, p["w1e"], p["b1"], p["s1"], p["sh1"],
            p["w2ae"], p["w2be"], p["b2"], p["s2"], p["sh2"]]
    if lin is not None:
        args += [lin["we"], lin["be"]]
    y = pl.pallas_call(
        _make_up_block_kernel(N, H, W, C1, C2, lin is not None),
        out_shape=jax.ShapeDtypeStruct((N * H, W * cout_lane), jnp.float32),
        scratch_shapes=[pltpu.VMEM((H + 2, W * C1), jnp.float32)],
    )(*args)
    return y.reshape(N, H, W, cout_lane)


def linear_relu(x2d, w, b):
    M, _ = x2d.shape
    C = w.shape[1]
    return pl.pallas_call(
        _linear_relu_kernel,
        out_shape=jax.ShapeDtypeStruct((M, C), jnp.float32),
    )(x2d, w, b.reshape(1, C))


def classifier_heads(h, cls):
    M = h.shape[0]
    nC = cls["w3"].shape[1]
    return pl.pallas_call(
        _classifier_kernel,
        out_shape=jax.ShapeDtypeStruct((M, nC), jnp.float32),
    )(h, cls["w1"], cls["b1"], cls["w2"], cls["b2"], cls["w3"], cls["b3"])


# ----------------------------- deterministic parameter init -----------------------------

def _init_linear(key, cin, cout):
    k1, k2 = jax.random.split(key)
    bound = 1.0 / np.sqrt(cin)
    w = jax.random.uniform(k1, (cin, cout), jnp.float32, -bound, bound)
    b = jax.random.uniform(k2, (cout,), jnp.float32, -bound, bound)
    return w, b


def _init_conv3x3(key, cin, cout):
    k1, k2 = jax.random.split(key)
    bound = 1.0 / np.sqrt(cin * 9)
    w = jax.random.uniform(k1, (3, 3, cin, cout), jnp.float32, -bound, bound)   # HWIO
    b = jax.random.uniform(k2, (cout,), jnp.float32, -bound, bound)
    return w, b


def _init_bn(key, c, eps=1e-5):
    """Eval-mode BatchNorm folded to y = x*scale + shift."""
    k1, k2, k3, k4 = jax.random.split(key, 4)
    gamma = jax.random.uniform(k1, (c,), jnp.float32, 0.5, 1.5)
    beta = 0.1 * jax.random.normal(k2, (c,), jnp.float32)
    mean = 0.1 * jax.random.normal(k3, (c,), jnp.float32)
    var = jax.random.uniform(k4, (c,), jnp.float32, 0.5, 1.5)
    scale = gamma / jnp.sqrt(var + eps)
    shift = beta - mean * scale
    return scale, shift


def _init_classifier_head(key, d, h1, h2):
    k = jax.random.split(key, 5)
    w1, b1 = _init_linear(k[0], d, h1)
    s1, sh1 = _init_bn(k[1], h1)
    w1, b1 = w1 * s1[None, :], b1 * s1 + sh1          # fold eval BN1d into the Linear
    w2, b2 = _init_linear(k[2], h1, h2)
    s2, sh2 = _init_bn(k[3], h2)
    w2, b2 = w2 * s2[None, :], b2 * s2 + sh2
    w3, b3 = _init_linear(k[4], h2, 1)
    return w1, b1, w2, b2, w3, b3


def init_params(key, cfg):
    dims = cfg["encoder_embedding_dims"]
    widths = cfg["encoder_embedding_widths"]
    fs = cfg["frame_size"]
    emb = cfg["node_embedding_dim"]
    ch = cfg["classifier_hidden_dim"]
    keys = iter(jax.random.split(key, 256))
    nk = lambda: next(keys)

    # ---- DownConv stack ----
    down_specs = [(cfg["in_channels"], dims[0] // 2, fs)]
    for i, f in enumerate(dims):
        down_specs.append((f // 2, f, widths[i]))
    conv_spatial = [cfg["input_size"]] + [s[2] for s in down_specs[:-1]]
    down_convs = []
    for (cin, cout, osz), sp in zip(down_specs, conv_spatial):
        w1, b1 = _init_conv3x3(nk(), cin, cout)
        s1, sh1 = _init_bn(nk(), cout)
        w2, b2 = _init_conv3x3(nk(), cout, cout)
        s2, sh2 = _init_bn(nk(), cout)
        down_convs.append(dict(
            cout=cout, out_size=osz, spatial=sp,
            w1e=_expand_conv_weight(w1, sp), b1=_tile_chan(b1, sp),
            s1=_tile_chan(s1, sp), sh1=_tile_chan(sh1, sp),
            w2e=_expand_conv_weight(w2, sp), b2=_tile_chan(b2, sp),
            s2=_tile_chan(s2, sp), sh2=_tile_chan(sh2, sp)))

    # ---- UpConv stack ----
    decoder_widths = list(reversed(widths))[1:] + [fs]
    up_convs = []
    for i, f in enumerate(reversed(dims)):
        cin, cout, osz = f, f // 2, decoder_widths[i]
        sp = osz
        w1, b1 = _init_conv3x3(nk(), cin, cout)
        s1, sh1 = _init_bn(nk(), cout)
        w2, b2 = _init_conv3x3(nk(), cin, cout)        # conv2 in_channels == cin (after concat)
        s2, sh2 = _init_bn(nk(), cout)
        w2 = np.asarray(w2)
        up_convs.append(dict(
            cout=cout, out_size=osz,
            w1e=_expand_conv_weight(w1, sp), b1=_tile_chan(b1, sp),
            s1=_tile_chan(s1, sp), sh1=_tile_chan(sh1, sp),
            w2ae=_expand_conv_weight(w2[:, :, :cout, :], sp),     # acts on conv1 output
            w2be=_expand_conv_weight(w2[:, :, cout:, :], sp),     # acts on the skip connection
            b2=_tile_chan(b2, sp), s2=_tile_chan(s2, sp), sh2=_tile_chan(sh2, sp)))

    # ---- 1x1 conv "linears" ----
    lin_in = list(reversed(dims)) + [list(reversed(dims))[-1] // 2]
    linears = []
    for cin in lin_in:
        w, b = _init_linear(nk(), cin, emb)
        linears.append(dict(w=w, b=b))
    # fused (width-expanded, block-diagonal) form of the last linear, applied inside the last UpConv
    w_last = np.asarray(linears[-1]["w"])
    b_last = np.asarray(linears[-1]["b"])
    lin_fused = dict(we=jnp.asarray(np.kron(np.eye(fs, dtype=np.float32), w_last)),
                     be=jnp.asarray(np.tile(b_last, fs).reshape(1, -1)))

    # ---- node classifiers, collapsed to block-diagonal weights ----
    nC, h1, h2 = cfg["num_output_channels"], ch, ch // 2
    W1 = np.zeros((emb, nC * h1), np.float32); B1 = np.zeros((1, nC * h1), np.float32)
    W2 = np.zeros((nC * h1, nC * h2), np.float32); B2 = np.zeros((1, nC * h2), np.float32)
    W3 = np.zeros((nC * h2, nC), np.float32); B3 = np.zeros((1, nC), np.float32)
    for c in range(nC):
        w1, b1, w2, b2, w3, b3 = _init_classifier_head(nk(), emb, h1, h2)
        W1[:, c * h1:(c + 1) * h1] = np.asarray(w1); B1[0, c * h1:(c + 1) * h1] = np.asarray(b1)
        W2[c * h1:(c + 1) * h1, c * h2:(c + 1) * h2] = np.asarray(w2)
        B2[0, c * h2:(c + 1) * h2] = np.asarray(b2)
        W3[c * h2:(c + 1) * h2, c] = np.asarray(w3)[:, 0]; B3[0, c] = np.asarray(b3)[0]
    cls = dict(w1=jnp.asarray(W1), b1=jnp.asarray(B1),
               w2=jnp.asarray(W2), b2=jnp.asarray(B2),
               w3=jnp.asarray(W3), b3=jnp.asarray(B3))

    return dict(down_convs=down_convs, up_convs=up_convs, linears=linears,
                lin_fused=lin_fused, cls=cls)


# ----------------------------- forward (UNETIntermediateNoGnn) -----------------------------

def forward(params, cfg, x=None, node_coords=None, edge_index=None, node_type=None, batch_idx=None):
    num_samples = int(np.asarray(batch_idx)[-1]) + 1
    emb = cfg["node_embedding_dim"]
    fs = cfg["frame_size"]

    xh = jnp.transpose(x.astype(jnp.float32), (0, 2, 3, 1))    # NCHW -> NHWC

    # UNET encoder: one fused pallas_call per DownConv (pool is XLA glue on a tiny tensor)
    skips = []
    cur = xh
    for dc in params["down_convs"]:
        skips.append(cur)
        cur = down_block(cur, dc)

    # UNET decoder: one fused pallas_call per UpConv; last one also applies linears[-1] + ReLU
    feats = [cur]                                  # features[0] = encoder output
    n_up = len(params["up_convs"])
    for i, uc in enumerate(params["up_convs"]):
        skip = skips.pop()
        last = (i == n_up - 1)
        cur = up_block(cur, skip, uc, lin=params["lin_fused"] if last else None)
        feats.append(cur)
    nf_last = feats[-1]                            # == relu(1x1 conv(features[-1])), (N, fs, fs, emb)

    # ---- main-graph node selection (node_type == 0) ----
    node_type_np = np.asarray(node_type)
    main_idx = np.where(node_type_np == 0)[0]
    feat_spatials = [f.shape[1] for f in feats[:-1]]
    aux_nodes = sum(feat_spatials[g] ** 2 for g in range(cfg["num_aux_graphs"]))
    main_nodes = fs * fs
    per_sample = aux_nodes + main_nodes
    expected = (np.arange(num_samples)[:, None] * per_sample + aux_nodes
                + np.arange(main_nodes)[None, :]).reshape(-1)
    if main_idx.shape[0] == expected.shape[0] and np.array_equal(main_idx, expected):
        # canonical layout: main-graph nodes are the trailing frame_size^2 rows of each sample's
        # block -> a static reshape, no gather; the aux-scale 1x1 convs cannot affect the output.
        h = nf_last.reshape(num_samples * main_nodes, emb)
    else:
        # general fallback: materialize all node features, then gather the requested rows
        parts = []
        for g in range(cfg["num_aux_graphs"]):
            f = feats[g]
            N, H, W, C = f.shape
            nf = linear_relu(f.reshape(N * H * W, C),
                             params["linears"][g]["w"], params["linears"][g]["b"])
            parts.append(nf.reshape(N, H * W, emb))
        parts.append(nf_last.reshape(num_samples, main_nodes, emb))
        h_all = jnp.concatenate(parts, axis=1).reshape(-1, emb)
        h = h_all[jnp.asarray(main_idx)]

    # 4 classifier heads in a single kernel, output (M, 4); squeeze(1) is a no-op for >1 heads
    h_out = classifier_heads(h, params["cls"])
    return h_out, None


# ----------------------------- demo -----------------------------

CONFIG = dict(
    in_channels=1,
    frame_size=8,
    input_size=16,
    encoder_embedding_widths=[4, 2],
    encoder_embedding_dims=[8, 16],
    node_embedding_dim=32,
    classifier_hidden_dim=16,
    num_output_channels=4,
    num_aux_graphs=2,
)

if __name__ == "__main__":
    key = jax.random.PRNGKey(0)
    pkey, xkey = jax.random.split(key)
    cfg = CONFIG
    params = init_params(pkey, cfg)

    N = 2
    x = jax.random.normal(xkey, (N, cfg["in_channels"], cfg["input_size"], cfg["input_size"]),
                          jnp.float32)

    # graph metadata (aux graph nodes: type 1; main graph nodes: type 0), per sample
    feat_spatials = list(reversed(cfg["encoder_embedding_widths"])) + [cfg["frame_size"]]  # [2,4,8]
    aux_nodes = sum(s * s for s in feat_spatials[:cfg["num_aux_graphs"]])
    main_nodes = cfg["frame_size"] ** 2
    per_sample_type = np.concatenate([np.ones(aux_nodes, np.int32), np.zeros(main_nodes, np.int32)])
    node_type = np.tile(per_sample_type, N)
    batch_idx = np.repeat(np.arange(N, dtype=np.int32), per_sample_type.shape[0])

    h_out, coords = forward(params, cfg, x=x, node_type=node_type, batch_idx=batch_idx)
    h_out = jax.block_until_ready(h_out)
    assert h_out.shape == (N * main_nodes, cfg["num_output_channels"])
    assert coords is None
    assert bool(jnp.all(jnp.isfinite(h_out)))
    print("KERNEL_OK")
</pallas_src>

<mosaic_0001>
module attributes {stable_mosaic.version = 11 : i64} {
  func.func @kernel(%arg0: memref<2x18x16xf32, #tpu.memory_space<vmem>>, %arg1: memref<3x16x64xf32, #tpu.memory_space<vmem>>, %arg2: memref<1x64xf32, #tpu.memory_space<vmem>>, %arg3: memref<1x64xf32, #tpu.memory_space<vmem>>, %arg4: memref<1x64xf32, #tpu.memory_space<vmem>>, %arg5: memref<3x64x64xf32, #tpu.memory_space<vmem>>, %arg6: memref<1x64xf32, #tpu.memory_space<vmem>>, %arg7: memref<1x64xf32, #tpu.memory_space<vmem>>, %arg8: memref<1x64xf32, #tpu.memory_space<vmem>>, %arg9: memref<32x64xf32, #tpu.memory_space<vmem>>, %arg10: memref<18x64xf32, #tpu.memory_space<vmem>>) attributes {dimension_semantics = [], scalar_prefetch = 0 : i64, scratch_operands = 1 : i64, tpu.core_type = #tpu.core_type<tc>} {
    %cst = arith.constant 0.000000e+00 : f32
    %0 = vector.broadcast %cst : f32 to vector<18x64xf32>
    %c0 = arith.constant 0 : index
    %c0_0 = arith.constant 0 : index
    %1 = vector.load %arg10[%c0, %c0_0] : memref<18x64xf32, #tpu.memory_space<vmem>>, vector<18x64xf32>
    tpu.vector_store %arg10[%c0, %c0_0], %0 {strides = array<i32>} : memref<18x64xf32, #tpu.memory_space<vmem>>, vector<18x64xf32>,
    %cst_1 = arith.constant 0.000000e+00 : f32
    %2 = vector.broadcast %cst_1 : f32 to vector<16x64xf32>
    %c0_2 = arith.constant 0 : index
    %c0_3 = arith.constant 0 : index
    %c0_4 = arith.constant 0 : index
    %3 = vector.load %arg0[%c0_2, %c0_3, %c0_4] : memref<2x18x16xf32, #tpu.memory_space<vmem>>, vector<1x16x16xf32>
    %4 = vector.shape_cast %3 : vector<1x16x16xf32> to vector<16x16xf32>
    %c0_5 = arith.constant 0 : index
    %c0_6 = arith.constant 0 : index
    %c0_7 = arith.constant 0 : index
    %5 = vector.load %arg1[%c0_5, %c0_6, %c0_7] : memref<3x16x64xf32, #tpu.memory_space<vmem>>, vector<1x16x64xf32>
    %6 = vector.shape_cast %5 : vector<1x16x64xf32> to vector<16x64xf32>
    %cst_8 = arith.constant dense<0.000000e+00> : vector<16x64xf32>
    %7 = tpu.matmul %4, %6, %cst_8 {dimension_numbers = #tpu.dot_dimension_numbers<[1], [0], [0], [1], [0, 0, 1, 1], [], []>} : vector<16x16xf32>, vector<16x64xf32>, vector<16x64xf32> -> vector<16x64xf32>
    %8 = arith.addf %2, %7 : vector<16x64xf32>
    %c0_9 = arith.constant 0 : index
    %c1 = arith.constant 1 : index
    %c0_10 = arith.constant 0 : index
    %9 = vector.load %arg0[%c0_9, %c1, %c0_10] : memref<2x18x16xf32, #tpu.memory_space<vmem>>, vector<1x16x16xf32>
    %10 = vector.shape_cast %9 : vector<1x16x16xf32> to vector<16x16xf32>
    %c1_11 = arith.constant 1 : index
    %c0_12 = arith.constant 0 : index
    %c0_13 = arith.constant 0 : index
    %11 = vector.load %arg1[%c1_11, %c0_12, %c0_13] : memref<3x16x64xf32, #tpu.memory_space<vmem>>, vector<1x16x64xf32>
    %12 = vector.shape_cast %11 : vector<1x16x64xf32> to vector<16x64xf32>
    %cst_14 = arith.constant dense<0.000000e+00> : vector<16x64xf32>
    %13 = tpu.matmul %10, %12, %cst_14 {dimension_numbers = #tpu.dot_dimension_numbers<[1], [0], [0], [1], [0, 0, 1, 1], [], []>} : vector<16x16xf32>, vector<16x64xf32>, vector<16x64xf32> -> vector<16x64xf32>
    %14 = arith.addf %8, %13 : vector<16x64xf32>
    %c0_15 = arith.constant 0 : index
    %c2 = arith.constant 2 : index
    %c0_16 = arith.constant 0 : index
    %15 = vector.load %arg0[%c0_15, %c2, %c0_16] : memref<2x18x16xf32, #tpu.memory_space<vmem>>, vector<1x16x16xf32>
    %16 = vector.shape_cast %15 : vector<1x16x16xf32> to vector<16x16xf32>
    %c2_17 = arith.constant 2 : index
    %c0_18 = arith.constant 0 : index
    %c0_19 = arith.constant 0 : index
    %17 = vector.load %arg1[%c2_17, %c0_18, %c0_19] : memref<3x16x64xf32, #tpu.memory_space<vmem>>, vector<1x16x64xf32>
    %18 = vector.shape_cast %17 : vector<1x16x64xf32> to vector<16x64xf32>
    %cst_20 = arith.constant dense<0.000000e+00> : vector<16x64xf32>
    %19 = tpu.matmul %16, %18, %cst_20 {dimension_numbers = #tpu.dot_dimension_numbers<[1], [0], [0], [1], [0, 0, 1, 1], [], []>} : vector<16x16xf32>, vector<16x64xf32>, vector<16x64xf32> -> vector<16x64xf32>
    %20 = arith.addf %14, %19 : vector<16x64xf32>
    %c0_21 = arith.constant 0 : index
    %c0_22 = arith.constant 0 : index
    %21 = vector.load %arg2[%c0_21, %c0_22] : memref<1x64xf32, #tpu.memory_space<vmem>>, vector<1x64xf32>
    %22 = vector.broadcast %21 : vector<1x64xf32> to vector<16x64xf32>
    %23 = arith.addf %20, %22 : vector<16x64xf32>
    %cst_23 = arith.constant 0.000000e+00 : f32
    %24 = vector.broadcast %cst_23 : f32 to vector<16x64xf32>
    %25 = arith.maximumf %23, %24 : vector<16x64xf32>
    %c0_24 = arith.constant 0 : index
    %c0_25 = arith.constant 0 : index
    %26 = vector.load %arg3[%c0_24, %c0_25] : memref<1x64xf32, #tpu.memory_space<vmem>>, vector<1x64xf32>
    %27 = vector.broadcast %26 : vector<1x64xf32> to vector<16x64xf32>
    %28 = arith.mulf %25, %27 : vector<16x64xf32>
    %c0_26 = arith.constant 0 : index
    %c0_27 = arith.constant 0 : index
    %29 = vector.load %arg4[%c0_26, %c0_27] : memref<1x64xf32, #tpu.memory_space<vmem>>, vector<1x64xf32>
    %30 = vector.broadcast %29 : vector<1x64xf32> to vector<16x64xf32>
    %31 = arith.addf %28, %30 : vector<16x64xf32>
    %c1_28 = arith.constant 1 : index
    %c0_29 = arith.constant 0 : index
    %32 = vector.load %arg10[%c1_28, %c0_29] : memref<18x64xf32, #tpu.memory_space<vmem>>, vector<16x64xf32>
    tpu.vector_store %arg10[%c1_28, %c0_29], %31 {strides = array<i32>} : memref<18x64xf32, #tpu.memory_space<vmem>>, vector<16x64xf32>,
    %cst_30 = arith.constant 0.000000e+00 : f32
    %33 = vector.broadcast %cst_30 : f32 to vector<16x64xf32>
    %c0_31 = arith.constant 0 : index
    %c0_32 = arith.constant 0 : index
    %34 = vector.load %arg10[%c0_31, %c0_32] : memref<18x64xf32, #tpu.memory_space<vmem>>, vector<16x64xf32>
    %c0_33 = arith.constant 0 : index
    %c0_34 = arith.constant 0 : index
    %c0_35 = arith.constant 0 : index
    %35 = vector.load %arg5[%c0_33, %c0_34, %c0_35] : memref<3x64x64xf32, #tpu.memory_space<vmem>>, vector<1x64x64xf32>
    %36 = vector.shape_cast %35 : vector<1x64x64xf32> to vector<64x64xf32>
    %cst_36 = arith.constant dense<0.000000e+00> : vector<16x64xf32>
    %37 = tpu.matmul %34, %36, %cst_36 {dimension_numbers = #tpu.dot_dimension_numbers<[1], [0], [0], [1], [0, 0, 1, 1], [], []>} : vector<16x64xf32>, vector<64x64xf32>, vector<16x64xf32> -> vector<16x64xf32>
    %38 = arith.addf %33, %37 : vector<16x64xf32>
    %c1_37 = arith.constant 1 : index
    %c0_38 = arith.constant 0 : index
    %39 = vector.load %arg10[%c1_37, %c0_38] : memref<18x64xf32, #tpu.memory_space<vmem>>, vector<16x64xf32>
    %c1_39 = arith.constant 1 : index
    %c0_40 = arith.constant 0 : index
    %c0_41 = arith.constant 0 : index
    %40 = vector.load %arg5[%c1_39, %c0_40, %c0_41] : memref<3x64x64xf32, #tpu.memory_space<vmem>>, vector<1x64x64xf32>
    %41 = vector.shape_cast %40 : vector<1x64x64xf32> to vector<64x64xf32>
    %cst_42 = arith.constant dense<0.000000e+00> : vector<16x64xf32>
    %42 = tpu.matmul %39, %41, %cst_42 {dimension_numbers = #tpu.dot_dimension_numbers<[1], [0], [0], [1], [0, 0, 1, 1], [], []>} : vector<16x64xf32>, vector<64x64xf32>, vector<16x64xf32> -> vector<16x64xf32>
    %43 = arith.addf %38, %42 : vector<16x64xf32>
    %c2_43 = arith.constant 2 : index
    %c0_44 = arith.constant 0 : index
    %44 = vector.load %arg10[%c2_43, %c0_44] : memref<18x64xf32, #tpu.memory_space<vmem>>, vector<16x64xf32>
    %c2_45 = arith.constant 2 : index
    %c0_46 = arith.constant 0 : index
    %c0_47 = arith.constant 0 : index
    %45 = vector.load %arg5[%c2_45, %c0_46, %c0_47] : memref<3x64x64xf32, #tpu.memory_space<vmem>>, vector<1x64x64xf32>
    %46 = vector.shape_cast %45 : vector<1x64x64xf32> to vector<64x64xf32>
    %cst_48 = arith.constant dense<0.000000e+00> : vector<16x64xf32>
    %47 = tpu.matmul %44, %46, %cst_48 {dimension_numbers = #tpu.dot_dimension_numbers<[1], [0], [0], [1], [0, 0, 1, 1], [], []>} : vector<16x64xf32>, vector<64x64xf32>, vector<16x64xf32> -> vector<16x64xf32>
    %48 = arith.addf %43, %47 : vector<16x64xf32>
    %c0_49 = arith.constant 0 : index
    %c0_50 = arith.constant 0 : index
    %49 = vector.load %arg6[%c0_49, %c0_50] : memref<1x64xf32, #tpu.memory_space<vmem>>, vector<1x64xf32>
    %50 = vector.broadcast %49 : vector<1x64xf32> to vector<16x64xf32>
    %51 = arith.addf %48, %50 : vector<16x64xf32>
    %cst_51 = arith.constant 0.000000e+00 : f32
    %52 = vector.broadcast %cst_51 : f32 to vector<16x64xf32>
    %53 = arith.maximumf %51, %52 : vector<16x64xf32>
    %c0_52 = arith.constant 0 : index
    %c0_53 = arith.constant 0 : index
    %54 = vector.load %arg7[%c0_52, %c0_53] : memref<1x64xf32, #tpu.memory_space<vmem>>, vector<1x64xf32>
    %55 = vector.broadcast %54 : vector<1x64xf32> to vector<16x64xf32>
    %56 = arith.mulf %53, %55 : vector<16x64xf32>
    %c0_54 = arith.constant 0 : index
    %c0_55 = arith.constant 0 : index
    %57 = vector.load %arg8[%c0_54, %c0_55] : memref<1x64xf32, #tpu.memory_space<vmem>>, vector<1x64xf32>
    %58 = vector.broadcast %57 : vector<1x64xf32> to vector<16x64xf32>
    %59 = arith.addf %56, %58 : vector<16x64xf32>
    %c0_56 = arith.constant 0 : index
    %c0_57 = arith.constant 0 : index
    %60 = vector.load %arg9[%c0_56, %c0_57] : memref<32x64xf32, #tpu.memory_space<vmem>>, vector<16x64xf32>
    tpu.vector_store %arg9[%c0_56, %c0_57], %59 {strides = array<i32>} : memref<32x64xf32, #tpu.memory_space<vmem>>, vector<16x64xf32>,
    %cst_58 = arith.constant 0.000000e+00 : f32
    %61 = vector.broadcast %cst_58 : f32 to vector<16x64xf32>
    %c1_59 = arith.constant 1 : index
    %c0_60 = arith.constant 0 : index
    %c0_61 = arith.constant 0 : index
    %62 = vector.load %arg0[%c1_59, %c0_60, %c0_61] : memref<2x18x16xf32, #tpu.memory_space<vmem>>, vector<1x16x16xf32>
    %63 = vector.shape_cast %62 : vector<1x16x16xf32> to vector<16x16xf32>
    %c0_62 = arith.constant 0 : index
    %c0_63 = arith.constant 0 : index
    %c0_64 = arith.constant 0 : index
    %64 = vector.load %arg1[%c0_62, %c0_63, %c0_64] : memref<3x16x64xf32, #tpu.memory_space<vmem>>, vector<1x16x64xf32>
    %65 = vector.shape_cast %64 : vector<1x16x64xf32> to vector<16x64xf32>
    %cst_65 = arith.constant dense<0.000000e+00> : vector<16x64xf32>
    %66 = tpu.matmul %63, %65, %cst_65 {dimension_numbers = #tpu.dot_dimension_numbers<[1], [0], [0], [1], [0, 0, 1, 1], [], []>} : vector<16x16xf32>, vector<16x64xf32>, vector<16x64xf32> -> vector<16x64xf32>
    %67 = arith.addf %61, %66 : vector<16x64xf32>
    %c1_66 = arith.constant 1 : index
    %c1_67 = arith.constant 1 : index
    %c0_68 = arith.constant 0 : index
    %68 = vector.load %arg0[%c1_66, %c1_67, %c0_68] : memref<2x18x16xf32, #tpu.memory_space<vmem>>, vector<1x16x16xf32>
    %69 = vector.shape_cast %68 : vector<1x16x16xf32> to vector<16x16xf32>
    %c1_69 = arith.constant 1 : index
    %c0_70 = arith.constant 0 : index
    %c0_71 = arith.constant 0 : index
    %70 = vector.load %arg1[%c1_69, %c0_70, %c0_71] : memref<3x16x64xf32, #tpu.memory_space<vmem>>, vector<1x16x64xf32>
    %71 = vector.shape_cast %70 : vector<1x16x64xf32> to vector<16x64xf32>
    %cst_72 = arith.constant dense<0.000000e+00> : vector<16x64xf32>
    %72 = tpu.matmul %69, %71, %cst_72 {dimension_numbers = #tpu.dot_dimension_numbers<[1], [0], [0], [1], [0, 0, 1, 1], [], []>} : vector<16x16xf32>, vector<16x64xf32>, vector<16x64xf32> -> vector<16x64xf32>
    %73 = arith.addf %67, %72 : vector<16x64xf32>
    %c1_73 = arith.constant 1 : index
    %c2_74 = arith.constant 2 : index
    %c0_75 = arith.constant 0 : index
    %74 = vector.load %arg0[%c1_73, %c2_74, %c0_75] : memref<2x18x16xf32, #tpu.memory_space<vmem>>, vector<1x16x16xf32>
    %75 = vector.shape_cast %74 : vector<1x16x16xf32> to vector<16x16xf32>
    %c2_76 = arith.constant 2 : index
    %c0_77 = arith.constant 0 : index
    %c0_78 = arith.constant 0 : index
    %76 = vector.load %arg1[%c2_76, %c0_77, %c0_78] : memref<3x16x64xf32, #tpu.memory_space<vmem>>, vector<1x16x64xf32>
    %77 = vector.shape_cast %76 : vector<1x16x64xf32> to vector<16x64xf32>
    %cst_79 = arith.constant dense<0.000000e+00> : vector<16x64xf32>
    %78 = tpu.matmul %75, %77, %cst_79 {dimension_numbers = #tpu.dot_dimension_numbers<[1], [0], [0], [1], [0, 0, 1, 1], [], []>} : vector<16x16xf32>, vector<16x64xf32>, vector<16x64xf32> -> vector<16x64xf32>
    %79 = arith.addf %73, %78 : vector<16x64xf32>
    %c0_80 = arith.constant 0 : index
    %c0_81 = arith.constant 0 : index
    %80 = vector.load %arg2[%c0_80, %c0_81] : memref<1x64xf32, #tpu.memory_space<vmem>>, vector<1x64xf32>
    %81 = vector.broadcast %80 : vector<1x64xf32> to vector<16x64xf32>
    %82 = arith.addf %79, %81 : vector<16x64xf32>
    %cst_82 = arith.constant 0.000000e+00 : f32
    %83 = vector.broadcast %cst_82 : f32 to vector<16x64xf32>
    %84 = arith.maximumf %82, %83 : vector<16x64xf32>
    %c0_83 = arith.constant 0 : index
    %c0_84 = arith.constant 0 : index
    %85 = vector.load %arg3[%c0_83, %c0_84] : memref<1x64xf32, #tpu.memory_space<vmem>>, vector<1x64xf32>
    %86 = vector.broadcast %85 : vector<1x64xf32> to vector<16x64xf32>
    %87 = arith.mulf %84, %86 : vector<16x64xf32>
    %c0_85 = arith.constant 0 : index
    %c0_86 = arith.constant 0 : index
    %88 = vector.load %arg4[%c0_85, %c0_86] : memref<1x64xf32, #tpu.memory_space<vmem>>, vector<1x64xf32>
    %89 = vector.broadcast %88 : vector<1x64xf32> to vector<16x64xf32>
    %90 = arith.addf %87, %89 : vector<16x64xf32>
    %c1_87 = arith.constant 1 : index
    %c0_88 = arith.constant 0 : index
    %91 = vector.load %arg10[%c1_87, %c0_88] : memref<18x64xf32, #tpu.memory_space<vmem>>, vector<16x64xf32>
    tpu.vector_store %arg10[%c1_87, %c0_88], %90 {strides = array<i32>} : memref<18x64xf32, #tpu.memory_space<vmem>>, vector<16x64xf32>,
    %cst_89 = arith.constant 0.000000e+00 : f32
    %92 = vector.broadcast %cst_89 : f32 to vector<16x64xf32>
    %c0_90 = arith.constant 0 : index
    %c0_91 = arith.constant 0 : index
    %93 = vector.load %arg10[%c0_90, %c0_91] : memref<18x64xf32, #tpu.memory_space<vmem>>, vector<16x64xf32>
    %c0_92 = arith.constant 0 : index
    %c0_93 = arith.constant 0 : index
    %c0_94 = arith.constant 0 : index
    %94 = vector.load %arg5[%c0_92, %c0_93, %c0_94] : memref<3x64x64xf32, #tpu.memory_space<vmem>>, vector<1x64x64xf32>
    %95 = vector.shape_cast %94 : vector<1x64x64xf32> to vector<64x64xf32>
    %cst_95 = arith.constant dense<0.000000e+00> : vector<16x64xf32>
    %96 = tpu.matmul %93, %95, %cst_95 {dimension_numbers = #tpu.dot_dimension_numbers<[1], [0], [0], [1], [0, 0, 1, 1], [], []>} : vector<16x64xf32>, vector<64x64xf32>, vector<16x64xf32> -> vector<16x64xf32>
    %97 = arith.addf %92, %96 : vector<16x64xf32>
    %c1_96 = arith.constant 1 : index
    %c0_97 = arith.constant 0 : index
    %98 = vector.load %arg10[%c1_96, %c0_97] : memref<18x64xf32, #tpu.memory_space<vmem>>, vector<16x64xf32>
    %c1_98 = arith.constant 1 : index
    %c0_99 = arith.constant 0 : index
    %c0_100 = arith.constant 0 : index
    %99 = vector.load %arg5[%c1_98, %c0_99, %c0_100] : memref<3x64x64xf32, #tpu.memory_space<vmem>>, vector<1x64x64xf32>
    %100 = vector.shape_cast %99 : vector<1x64x64xf32> to vector<64x64xf32>
    %cst_101 = arith.constant dense<0.000000e+00> : vector<16x64xf32>
    %101 = tpu.matmul %98, %100, %cst_101 {dimension_numbers = #tpu.dot_dimension_numbers<[1], [0], [0], [1], [0, 0, 1, 1], [], []>} : vector<16x64xf32>, vector<64x64xf32>, vector<16x64xf32> -> vector<16x64xf32>
    %102 = arith.addf %97, %101 : vector<16x64xf32>
    %c2_102 = arith.constant 2 : index
    %c0_103 = arith.constant 0 : index
    %103 = vector.load %arg10[%c2_102, %c0_103] : memref<18x64xf32, #tpu.memory_space<vmem>>, vector<16x64xf32>
    %c2_104 = arith.constant 2 : index
    %c0_105 = arith.constant 0 : index
    %c0_106 = arith.constant 0 : index
    %104 = vector.load %arg5[%c2_104, %c0_105, %c0_106] : memref<3x64x64xf32, #tpu.memory_space<vmem>>, vector<1x64x64xf32>
    %105 = vector.shape_cast %104 : vector<1x64x64xf32> to vector<64x64xf32>
    %cst_107 = arith.constant dense<0.000000e+00> : vector<16x64xf32>
    %106 = tpu.matmul %103, %105, %cst_107 {dimension_numbers = #tpu.dot_dimension_numbers<[1], [0], [0], [1], [0, 0, 1, 1], [], []>} : vector<16x64xf32>, vector<64x64xf32>, vector<16x64xf32> -> vector<16x64xf32>
    %107 = arith.addf %102, %106 : vector<16x64xf32>
    %c0_108 = arith.constant 0 : index
    %c0_109 = arith.constant 0 : index
    %108 = vector.load %arg6[%c0_108, %c0_109] : memref<1x64xf32, #tpu.memory_space<vmem>>, vector<1x64xf32>
    %109 = vector.broadcast %108 : vector<1x64xf32> to vector<16x64xf32>
    %110 = arith.addf %107, %109 : vector<16x64xf32>
    %cst_110 = arith.constant 0.000000e+00 : f32
    %111 = vector.broadcast %cst_110 : f32 to vector<16x64xf32>
    %112 = arith.maximumf %110, %111 : vector<16x64xf32>
    %c0_111 = arith.constant 0 : index
    %c0_112 = arith.constant 0 : index
    %113 = vector.load %arg7[%c0_111, %c0_112] : memref<1x64xf32, #tpu.memory_space<vmem>>, vector<1x64xf32>
    %114 = vector.broadcast %113 : vector<1x64xf32> to vector<16x64xf32>
    %115 = arith.mulf %112, %114 : vector<16x64xf32>
    %c0_113 = arith.constant 0 : index
    %c0_114 = arith.constant 0 : index
    %116 = vector.load %arg8[%c0_113, %c0_114] : memref<1x64xf32, #tpu.memory_space<vmem>>, vector<1x64xf32>
    %117 = vector.broadcast %116 : vector<1x64xf32> to vector<16x64xf32>
    %118 = arith.addf %115, %117 : vector<16x64xf32>
    %c16 = arith.constant 16 : index
    %c0_115 = arith.constant 0 : index
    %119 = vector.load %arg9[%c16, %c0_115] : memref<32x64xf32, #tpu.memory_space<vmem>>, vector<16x64xf32>
    tpu.vector_store %arg9[%c16, %c0_115], %118 {strides = array<i32>} : memref<32x64xf32, #tpu.memory_space<vmem>>, vector<16x64xf32>,
    return
  }
}

</mosaic_0001>

<bundles_post_ra>
// kernel: tpu_custom_call.1
= control target key start
LH: loop header
LB: loop body
LE: loop exit
PB: predicated region body
PF: predicated region fallthrough
CT: control target
= control target key end

     0   :  { %14 = vsyncpa [#allocation4], 0  ;;  %s1957_s0 = inlined_call_operand.vmem [shape: f32[2,18,16], index: 0, kind: input, shape index: {}]   ;;  %s1958_s1 = inlined_call_operand.vmem [shape: f32[3,16,64], index: 1, kind: input, shape index: {}]   ;;  %s1959_s2 = inlined_call_operand.vmem [shape: f32[1,64], index: 2, kind: input, shape index: {}]   ;;  %s1960_s3 = inlined_call_operand.vmem [shape: f32[1,64], index: 3, kind: input, shape index: {}]   ;;  %s1961_s4 = inlined_call_operand.vmem [shape: f32[1,64], index: 4, kind: input, shape index: {}]   ;;  %s1962_s5 = inlined_call_operand.hbm [shape: f32[3,64,64], index: 5, kind: input, shape index: {}]   ;;  %s1963_s6 = inlined_call_operand.vmem [shape: f32[1,64], index: 6, kind: input, shape index: {}]   ;;  %s1964_s7 = inlined_call_operand.vmem [shape: f32[1,64], index: 7, kind: input, shape index: {}]   ;;  %s1965_s8 = inlined_call_operand.vmem [shape: f32[1,64], index: 8, kind: input, shape index: {}]   ;;  %s1966_s9 = inlined_call_operand.hbm [shape: f32[32,64], index: 9, kind: output, shape index: {}]  }
   0x1   :  { %15 = vsyncpa [#allocation5], 0  ;;  %s1742_s30 = smov [#allocation3]   ;;  %s1694_s13 = scalar_lea.hbm %s1962_s5, 3072 }
   0x2   :  { %s31_s10 = sshll.u32 %s1742_s30, 4  ;;  %p1695_p0 = scmp.ne.s32.totalorder %s1962_s5, %s1694_s13  ;;  %s32_s10 = int_to_ptr.vmem [resolvable:$true] %s31_s10 }
   0x3   :  { %p1698_p1 = scmp.lt.u32.totalorder %s1694_s13, %s1962_s5 }
   0x5   :  { %p1700_p2 = pnand %p1698_p1, %p1695_p0 }
   0x7   :  { %1703 = shalt.err (!%p1700_p2)
}
   0x8   :  { %s1704_s18 = scalar_lea.vmem %s32_s10, 3072  ;;  %p1709_p4 = scmp.lt.s32.totalorder %s32_s10, %s32_s10 }
   0x9   :  { %p1705_p3 = scmp.ne.s32.totalorder %s32_s10, %s1704_s18  ;;  %p1710_p5 = scmp.lt.s32.totalorder %s1704_s18, %s1704_s18 }
   0xb   :  { %p1711_p6 = por %p1710_p5, %p1709_p4 }
   0xd   :  { %p1712_p7 = pnand %p1711_p6, %p1705_p3 }
   0xf   :  { %1715 = shalt.err (!%p1712_p7)
}
  0x10   :  { %s1743_s19 = smov 128   ;;  %s1744_s20 = smov 8  }
  0x11   :  { %37 = dma.hbm_to_vmem [thread:$0]  %s1962_s5, 3072, %s32_s10, [#allocation4], %s1743_s19, %s1743_s19, %s1744_s20  }
  0x12   :  { %1738 = dma.done.wait [#allocation4], 3072  }
  0x13   :  { %1739 = vsyncadd [#allocation4], 4294964224  ;;  %vm47_vm0 = vcmask 523264   ;;  %vm50_vm1 = vcmask 517120   ;;  %v1745_v0 = vmov 0.0   ;;  %vm61_vm2 = vcmask 130048  }
  0x14   :  { %49 = vst.msk [vmem:[#allocation2 + $0x8] sm:$0xff] %vm47_vm0, %v1745_v0  ;;  %48 = vst.msk [vmem:[#allocation2] sm:$0xff] %vm47_vm0, %v1745_v0  ;;  %v1263_v1 = vld [vmem:[%s1958_s1 + $0x10] sm:$0xff]  ;;  %v1264_v2 = vld [vmem:[%s1958_s1 + $0x18] sm:$0xff] }
  0x15   :  { %51 = vst.msk [vmem:[#allocation2 + $0x10] sm:$0x3] %vm50_vm1, %v1745_v0  ;;  %v56_v3 = vld [vmem:[%s1957_s0 + $0x1] sm:$0xff]  ;;  %v1553_v4 = vpack.c.bf16 %v1264_v2, %v1263_v1  ;;  %v57_v10 = vld [vmem:[%s1957_s0 + $0x9] sm:$0xff]  ;;  %v1287_v16 = vld [vmem:[%s1957_s0 + $0x19] sm:$0xff] }
  0x16   :  { %1401 = vmatprep.mubr.msk.f32.mxu0 %vm61_vm2, %v56_v3  ;;  %v54_v5 = vld [vmem:[%s1958_s1] sm:$0xff]  ;;  %v55_v6 = vld [vmem:[%s1958_s1 + $0x8] sm:$0xff]  ;;  %v1285_v18 = vld [vmem:[%s1957_s0 + $0x18] sm:$0xff] }
  0x17   :  { %v1557_v7 = vpack.c.bf16 %v55_v6, %v54_v5  ;;  %v1269_v8 = vld [vmem:[%s1958_s1 + $0x20] sm:$0xff]  ;;  %1554 = vmatprep.subr.bf16.mxu0 %v1553_v4  ;;  %v1270_v9 = vld [vmem:[%s1958_s1 + $0x28] sm:$0xff]  ;;  %v356_v22 = vld [vmem:[#allocation3 + $0x40] sm:$0xff] }
  0x18   :  { %1556 = vmatpush3.bf16.msra.mxu0 %v1553_v4  ;;  %v52_v11 = vld [vmem:[%s1957_s0] sm:$0xff]  ;;  %v1561_v12 = vpack.c.bf16 %v1270_v9, %v1269_v8  ;;  %v53_v13 = vld [vmem:[%s1957_s0 + $0x8] sm:$0xff]  ;;  %v359_v26 = vld [vmem:[#allocation3 + $0x58] sm:$0xff] }
  0x19   :  { %1558 = vmatprep.subr.bf16.mxu0 %v1557_v7  ;;  %v224_v14 = vld [vmem:[%s1957_s0 + $0x2] sm:$0xff]  ;;  %v225_v15 = vld [vmem:[%s1957_s0 + $0xa] sm:$0xff]  ;;  %v1295_v20 = vld [vmem:[%s1957_s0 + $0x1a] sm:$0xff] }
  0x1a   :  { %v1288_v17 = vld [vmem:[%s1957_s0 + $0x21] sm:$0xff]  ;;  %v360_v28 = vld [vmem:[#allocation3 + $0x60] sm:$0xff]  ;;  %v363_v32 = vld [vmem:[#allocation3 + $0x78] sm:$0xff] }
  0x1b   :  { %1402 = vmatmul.mubr.msk.f32.vlgmr.msra.gmra.mrb[0].mxu0 %vm61_vm2, %v57_v10  ;;  %v1286_v19 = vld [vmem:[%s1957_s0 + $0x20] sm:$0xff]  ;;  %v358_v25 = vld [vmem:[#allocation3 + $0x50] sm:$0xff]  ;;  %v345_v34 = vld [vmem:[#allocation3] sm:$0xff] }
  0x1c   :  { %1560 = vmatpush3.bf16.msra.mxu0 %v1557_v7  ;;  %1408 = vmatprep.mubr.msk.f32.mxu0 %vm61_vm2, %v52_v11  ;;  %v1296_v21 = vld [vmem:[%s1957_s0 + $0x22] sm:$0xff]  ;;  %v1884_v27 = vpack.c.bf16 %v359_v26, %v358_v25  ;;  %v348_v38 = vld [vmem:[#allocation3 + $0x18] sm:$0xff]  ;;  %v349_v40 = vld [vmem:[#allocation3 + $0x20] sm:$0xff] }
  0x1d   :  { %1562 = vmatprep.subr.bf16.mxu0 %v1561_v12  ;;  %v357_v23 = vld [vmem:[#allocation3 + $0x48] sm:$0xff]  ;;  %v362_v31 = vld [vmem:[#allocation3 + $0x70] sm:$0xff]  ;;  %v352_v44 = vld [vmem:[#allocation3 + $0x38] sm:$0xff] }
  0x1e   :  { %v1880_v24 = vpack.c.bf16 %v357_v23, %v356_v22  ;;  %v361_v29 = vld [vmem:[#allocation3 + $0x68] sm:$0xff]  ;;  %v1892_v33 = vpack.c.bf16 %v363_v32, %v362_v31  ;;  %v347_v37 = vld [vmem:[#allocation3 + $0x10] sm:$0xff]  ;;  %v529_v46 = vld [vmem:[#allocation3 + $0x80] sm:$0xff] }
  0x1f   :  { %v1888_v30 = vpack.c.bf16 %v361_v29, %v360_v28  ;;  %v346_v35 = vld [vmem:[#allocation3 + $0x8] sm:$0xff]  ;;  %v1585_v39 = vpack.c.bf16 %v348_v38, %v347_v37  ;;  %v351_v43 = vld [vmem:[#allocation3 + $0x30] sm:$0xff]  ;;  %v536_v23 = vld [vmem:[#allocation3 + $0xb8] sm:$0xff] }
  0x20   :  { %1566 = vmatprep.subr.bf16.mxu1 %v1880_v24  ;;  %v1581_v36 = vpack.c.bf16 %v346_v35, %v345_v34  ;;  %v350_v41 = vld [vmem:[#allocation3 + $0x28] sm:$0xff]  ;;  %v1593_v45 = vpack.c.bf16 %v352_v44, %v351_v43  ;;  %v535_v22 = vld [vmem:[#allocation3 + $0xb0] sm:$0xff] }
  0x21   :  { %1568 = vmatpush3.bf16.msra.mxu1 %v1880_v24  ;;  %v1589_v42 = vpack.c.bf16 %v350_v41, %v349_v40  ;;  %v530_v47 = vld [vmem:[#allocation3 + $0x88] sm:$0xff]  ;;  %v1609_v26 = vpack.c.bf16 %v536_v23, %v535_v22 }
  0x22   :  { %1570 = vmatprep.subr.bf16.mxu1 %v1884_v27  ;;  %v1597_v48 = vpack.c.bf16 %v530_v47, %v529_v46  ;;  %v1273_v49 = vld [vmem:[%s1959_s2] ss:$0 sm:$0xff] }
  0x23   :  { %1409 = vmatmul.mubr.msk.f32.vlgmr.msra.gmra.mrb[0].mxu0 %vm61_vm2, %v53_v13  ;;  %v1274_v53 = vld [vmem:[%s1960_s3] ss:$0 sm:$0xff] }
  0x24   :  { %1564 = vmatpush3.bf16.msra.mxu0 %v1561_v12  ;;  %1415 = vmatprep.mubr.msk.f32.mxu0 %vm61_vm2, %v224_v14  ;;  %v1275_v56 = vld [vmem:[%s1961_s4] ss:$0 sm:$0xff]  ;;  %v531_v14 = vld [vmem:[#allocation3 + $0x90] sm:$0xff] }
  0x25   :  { %1614 = vmatprep.subr.bf16.mxu0 %v1553_v4  ;;  %1572 = vmatpush3.bf16.msra.mxu1 %v1884_v27 }
  0x26   :  { %1574 = vmatprep.subr.bf16.mxu1 %v1888_v30 }
  0x29   :  { %1576 = vmatpush3.bf16.msra.mxu1 %v1888_v30 }
  0x2a   :  { %1578 = vmatprep.subr.bf16.mxu1 %v1892_v33 }
  0x2b   :  { %1416 = vmatmul.mubr.msk.f32.vlgmr.msra.gmra.mrb[0].mxu0 %vm61_vm2, %v225_v15  ;;  %v532_v15 = vld [vmem:[#allocation3 + $0x98] sm:$0xff] }
  0x2c   :  { %1616 = vmatpush3.bf16.msra.mxu0 %v1553_v4  ;;  %1479 = vmatprep.mubr.msk.f32.mxu0 %vm61_vm2, %v1287_v16  ;;  %v1601_v16 = vpack.c.bf16 %v532_v15, %v531_v14 }
  0x2d   :  { %1618 = vmatprep.subr.bf16.mxu0 %v1557_v7  ;;  %1580 = vmatpush3.bf16.msra.mxu1 %v1892_v33 }
  0x2e   :  { %1582 = vmatprep.subr.bf16.mxu1 %v1581_v36 }
  0x2f   :  { %1480 = vmatmul.mubr.msk.f32.vlgmr.msra.gmra.mrb[2].mxu0 %vm61_vm2, %v1288_v17  ;;  %v533_v17 = vld [vmem:[#allocation3 + $0xa0] sm:$0xff] }
  0x30   :  { %1620 = vmatpush3.bf16.msra.mxu0 %v1557_v7  ;;  %1486 = vmatprep.mubr.msk.f32.mxu0 %vm61_vm2, %v1285_v18  ;;  %v534_v18 = vld [vmem:[#allocation3 + $0xa8] sm:$0xff] }
  0x31   :  { %1622 = vmatprep.subr.bf16.mxu0 %v1561_v12 }
  0x37   :  { %1487 = vmatmul.mubr.msk.f32.vlgmr.msra.gmra.mrb[2].mxu0 %vm61_vm2, %v1286_v19 }
  0x38   :  { %1624 = vmatpush3.bf16.msra.mxu0 %v1561_v12  ;;  %1493 = vmatprep.mubr.msk.f32.mxu0 %vm61_vm2, %v1295_v20 }
  0x39   :  { %1642 = vmatprep.subr.bf16.mxu0 %v1581_v36 }
  0x3f   :  { %1494 = vmatmul.mubr.msk.f32.vlgmr.msra.gmra.mrb[2].mxu0 %vm61_vm2, %v1296_v21  ;;  %v1605_v21 = vpack.c.bf16 %v534_v18, %v533_v17 }
  0x40   :  { %1644 = vmatpush3.bf16.msra.mxu0 %v1581_v36 }
  0x41   :  { %1646 = vmatprep.subr.bf16.mxu0 %v1585_v39 }
  0x44   :  { %1648 = vmatpush3.bf16.msra.mxu0 %v1585_v39 }
  0x45   :  { %1650 = vmatprep.subr.bf16.mxu0 %v1589_v42 }
  0x48   :  { %1652 = vmatpush3.bf16.msra.mxu0 %v1589_v42 }
  0x49   :  { %1654 = vmatprep.subr.bf16.mxu0 %v1593_v45 }
  0x4c   :  { %1656 = vmatpush3.bf16.msra.mxu0 %v1593_v45 }
  0x4d   :  { %1658 = vmatprep.subr.bf16.mxu0 %v1597_v48 }
  0xfe   :  { %v1417_v50 = vpop.f32.mrb[0].mxu0 }
  0xff   :  { %v320_v51 = vadd.f32 %v1417_v50, %v1273_v49  ;;  %v301_v52 = vpop.f32.mrb[1].mxu0 }
 0x100   :  { %v319_v54 = vadd.f32 %v1273_v49, %v301_v52 }
 0x101   :  { %v322_v55 = vmax.f32 %v320_v51, 0.0 }
 0x102   :  { %v321_v57 = vmax.f32 %v319_v54, 0.0 }
 0x103   :  { %v331_v58 = vmul.f32 %v1274_v53, %v322_v55 }
 0x104   :  { %v330_v59 = vmul.f32 %v1274_v53, %v321_v57 }
 0x105   :  { %v340_v60 = vadd.f32 %v1275_v56, %v331_v58 }
 0x106   :  { %v339_v61 = vadd.f32 %v1275_v56, %v330_v59 }
 0x107   :  { %342 = vst.msk [vmem:[#allocation2 + $0x9] sm:$0xff] %vm47_vm0, %v340_v60 }
 0x108   :  { %341 = vst.msk [vmem:[#allocation2 + $0x1] sm:$0xff] %vm47_vm0, %v339_v61 }
 0x10e   :  { %v354_v63 = vld [vmem:[#allocation2 + $0x9] sm:$0xff] }
 0x10f   :  { %v353_v62 = vld [vmem:[#allocation2 + $0x1] sm:$0xff]  ;;  %v527_v13 = vld [vmem:[#allocation2 + $0xa] sm:$0xff] }
 0x110   :  { %1434 = vmatprep.mubr.msk.f32.mxu1 %vm47_vm0, %v353_v62  ;;  %v343_v0 = vld [vmem:[#allocation2] sm:$0xff]  ;;  %v344_v11 = vld [vmem:[#allocation2 + $0x8] sm:$0xff] }
 0x111   :  { %1435 = vmatmul.mubr.msk.f32.vlgmr.msra.gmra.mrb[0].mxu1 %vm47_vm0, %v354_v63  ;;  %v526_v12 = vld [vmem:[#allocation2 + $0x2] sm:$0xff] }
 0x112   :  { %1584 = vmatpush3.bf16.msra.mxu1 %v1581_v36  ;;  %1453 = vmatprep.mubr.msk.f32.mxu1 %vm47_vm0, %v343_v0  ;;  %v1495_v1 = vpop.f32.mrb[2].mxu0 }
 0x113   :  { %v917_v2 = vadd.f32 %v1495_v1, %v1273_v49  ;;  %v898_v3 = vpop.f32.mrb[3].mxu0  ;;  %1586 = vmatprep.subr.bf16.mxu1 %v1585_v39 }
 0x114   :  { %v916_v4 = vadd.f32 %v1273_v49, %v898_v3 }
 0x115   :  { %v919_v5 = vmax.f32 %v917_v2, 0.0 }
 0x116   :  { %v918_v6 = vmax.f32 %v916_v4, 0.0  ;;  %1588 = vmatpush3.bf16.msra.mxu1 %v1585_v39 }
 0x117   :  { %v928_v7 = vmul.f32 %v1274_v53, %v919_v5  ;;  %1590 = vmatprep.subr.bf16.mxu1 %v1589_v42 }
 0x118   :  { %v927_v8 = vmul.f32 %v1274_v53, %v918_v6 }
 0x119   :  { %v937_v9 = vadd.f32 %v1275_v56, %v928_v7 }
 0x11a   :  { %v936_v10 = vadd.f32 %v1275_v56, %v927_v8  ;;  %1592 = vmatpush3.bf16.msra.mxu1 %v1589_v42 }
 0x11b   :  { %1594 = vmatprep.subr.bf16.mxu1 %v1593_v45  ;;  %939 = vst.msk [vmem:[#allocation2 + $0x9] sm:$0xff] %vm47_vm0, %v937_v9 }
 0x11c   :  { %938 = vst.msk [vmem:[#allocation2 + $0x1] sm:$0xff] %vm47_vm0, %v936_v10 }
 0x11e   :  { %1596 = vmatpush3.bf16.msra.mxu1 %v1593_v45 }
 0x11f   :  { %1598 = vmatprep.subr.bf16.mxu1 %v1597_v48 }
 0x121   :  { %1454 = vmatmul.mubr.msk.f32.vlgmr.msra.gmra.mrb[0].mxu1 %vm47_vm0, %v344_v11 }
 0x122   :  { %1600 = vmatpush3.bf16.msra.mxu1 %v1597_v48  ;;  %1472 = vmatprep.mubr.msk.f32.mxu1 %vm47_vm0, %v526_v12  ;;  %v1123_v29 = vld [vmem:[#allocation2 + $0xa] sm:$0xff] }
 0x123   :  { %1602 = vmatprep.subr.bf16.mxu1 %v1601_v16  ;;  %v940_v19 = vld [vmem:[#allocation2] sm:$0xff]  ;;  %v941_v20 = vld [vmem:[#allocation2 + $0x8] sm:$0xff] }
 0x124   :  { %1531 = vmatprep.mubr.msk.f32.mxu0 %vm47_vm0, %v940_v19  ;;  %v1122_v25 = vld [vmem:[#allocation2 + $0x2] sm:$0xff] }
 0x125   :  { %1532 = vmatmul.mubr.msk.f32.vlgmr.msra.gmra.mrb[4].mxu0 %vm47_vm0, %v941_v20  ;;  %v950_v28 = vld [vmem:[#allocation2 + $0x1] sm:$0xff]  ;;  %v951_v31 = vld [vmem:[#allocation2 + $0x9] sm:$0xff] }
 0x126   :  { %1604 = vmatpush3.bf16.msra.mxu1 %v1601_v16  ;;  %1660 = vmatpush3.bf16.msra.mxu0 %v1597_v48 }
 0x127   :  { %1550 = vmatprep.mubr.msk.f32.mxu0 %vm47_vm0, %v1122_v25  ;;  %1606 = vmatprep.subr.bf16.mxu1 %v1605_v21 }
 0x128   :  { %1662 = vmatprep.subr.bf16.mxu0 %v1601_v16 }
 0x12a   :  { %1608 = vmatpush3.bf16.msra.mxu1 %v1605_v21  ;;  %1664 = vmatpush3.bf16.msra.mxu0 %v1601_v16 }
 0x12b   :  { %1610 = vmatprep.subr.bf16.mxu1 %v1609_v26  ;;  %1666 = vmatprep.subr.bf16.mxu0 %v1605_v21 }
 0x12e   :  { %1612 = vmatpush3.bf16.msra.mxu1 %v1609_v26  ;;  %1668 = vmatpush3.bf16.msra.mxu0 %v1605_v21 }
 0x12f   :  { %1626 = vmatprep.subr.bf16.mxu1 %v1880_v24  ;;  %1670 = vmatprep.subr.bf16.mxu0 %v1609_v26 }
 0x131   :  { %1473 = vmatmul.mubr.msk.f32.vlgmr.msra.gmra.mrb[0].mxu1 %vm47_vm0, %v527_v13 }
 0x132   :  { %1628 = vmatpush3.bf16.msra.mxu1 %v1880_v24  ;;  %1512 = vmatprep.mubr.msk.f32.mxu1 %vm47_vm0, %v950_v28  ;;  %v1282_v24 = vld [vmem:[%s1963_s6] ss:$0 sm:$0xff]  ;;  %s1746_s6 = smov [#allocation6]  }
 0x133   :  { %1672 = vmatpush3.bf16.msra.mxu0 %v1609_v26  ;;  %1630 = vmatprep.subr.bf16.mxu1 %v1884_v27 }
 0x136   :  { %1551 = vmatmul.mubr.msk.f32.vlgmr.msra.gmra.mrb[4].mxu0 %vm47_vm0, %v1123_v29  ;;  %1632 = vmatpush3.bf16.msra.mxu1 %v1884_v27  ;;  %v1283_v27 = vld [vmem:[%s1964_s7] ss:$0 sm:$0xff]  ;;  %s1251_s7 = sshll.u32 %s1746_s6, 4  ;;  %s1252_s7 = int_to_ptr.vmem [resolvable:$true] %s1251_s7 }
 0x137   :  { %1634 = vmatprep.subr.bf16.mxu1 %v1888_v30  ;;  %p1721_p9 = scmp.lt.s32.totalorder %s1252_s7, %s1252_s7 }
 0x13a   :  { %1636 = vmatpush3.bf16.msra.mxu1 %v1888_v30 }
 0x13b   :  { %1638 = vmatprep.subr.bf16.mxu1 %v1892_v33 }
 0x13e   :  { %1640 = vmatpush3.bf16.msra.mxu1 %v1892_v33  ;;  %v1284_v33 = vld [vmem:[%s1965_s8] ss:$0 sm:$0xff]  ;;  %s1716_s8 = scalar_lea.vmem %s1252_s7, 512 }
 0x13f   :  { %p1717_p8 = scmp.ne.s32.totalorder %s1252_s7, %s1716_s8  ;;  %p1722_p10 = scmp.lt.s32.totalorder %s1716_s8, %s1716_s8 }
 0x141   :  { %1513 = vmatmul.mubr.msk.f32.vlgmr.msra.gmra.mrb[2].mxu1 %vm47_vm0, %v951_v31  ;;  %p1723_p11 = por %p1722_p10, %p1721_p9 }
 0x143   :  { %p1724_p12 = pnand %p1723_p11, %p1717_p8 }
 0x204   :  { %v1474_v32 = vpop.f32.mrb[0].mxu1 }
 0x205   :  { %v628_v34 = vadd.f32 %v1474_v32, %v1282_v24  ;;  %v609_v35 = vpop.f32.mrb[1].mxu1 }
 0x206   :  { %v627_v36 = vadd.f32 %v1282_v24, %v609_v35 }
 0x207   :  { %v630_v30 = vmax.f32 %v628_v34, 0.0 }
 0x208   :  { %v629_v37 = vmax.f32 %v627_v36, 0.0 }
 0x209   :  { %v639_v38 = vmul.f32 %v1283_v27, %v630_v30  ;;  %v1552_v39 = vpop.f32.mrb[4].mxu0 }
 0x20a   :  { %v638_v40 = vmul.f32 %v1283_v27, %v629_v37  ;;  %v1204_v41 = vpop.f32.mrb[5].mxu0 }
 0x20b   :  { %v648_v42 = vadd.f32 %v1284_v33, %v639_v38 }
 0x20c   :  { %v647_v43 = vadd.f32 %v1284_v33, %v638_v40 }
 0x20d   :  { %650 = vst.msk [vmem:[#allocation6 + $0x8] sm:$0xff] %vm47_vm0, %v648_v42 }
 0x20e   :  { %649 = vst.msk [vmem:[#allocation6] sm:$0xff] %vm47_vm0, %v647_v43 }
 0x214   :  { %v1514_v44 = vpop.f32.mrb[2].mxu1 }
 0x215   :  { %v1673_v45 = vadd.f32 %v1552_v39, %v1514_v44  ;;  %v1032_v46 = vpop.f32.mrb[3].mxu1 }
 0x216   :  { %v1674_v47 = vadd.f32 %v1204_v41, %v1032_v46 }
 0x217   :  { %v1223_v48 = vadd.f32 %v1673_v45, %v1282_v24 }
 0x218   :  { %v1222_v49 = vadd.f32 %v1674_v47, %v1282_v24 }
 0x219   :  { %v1225_v50 = vmax.f32 %v1223_v48, 0.0 }
 0x21a   :  { %v1224_v51 = vmax.f32 %v1222_v49, 0.0 }
 0x21b   :  { %v1234_v52 = vmul.f32 %v1283_v27, %v1225_v50 }
 0x21c   :  { %v1233_v53 = vmul.f32 %v1283_v27, %v1224_v51 }
 0x21d   :  { %v1243_v54 = vadd.f32 %v1284_v33, %v1234_v52 }
 0x21e   :  { %v1242_v55 = vadd.f32 %v1284_v33, %v1233_v53 }
 0x21f   :  { %1245 = vst.msk [vmem:[#allocation6 + $0x18] sm:$0xff] %vm47_vm0, %v1243_v54 }
 0x220   :  { %1244 = vst.msk [vmem:[#allocation6 + $0x10] sm:$0xff] %vm47_vm0, %v1242_v55 }
 0x221   :  { %1727 = shalt.err (!%p1724_p12)
}
 0x222   :  { %s1728_s5 = scalar_lea.hbm %s1966_s9, 512 }
 0x223   :  { %p1729_p13 = scmp.ne.s32.totalorder %s1966_s9, %s1728_s5  ;;  %p1732_p0 = scmp.lt.u32.totalorder %s1728_s5, %s1966_s9 }
 0x225   :  { %p1734_p1 = pnand %p1732_p0, %p1729_p13 }
 0x227   :  { %1737 = shalt.err (!%p1734_p1)
}
 0x228   :  { %1257 = dma.vmem_to_hbm [thread:$0]  %s1252_s7, 512, %s1966_s9, [#allocation5], %s1743_s19, %s1743_s19, %s1744_s20  }
 0x229   :  { %1740 = dma.done.wait [#allocation5], 512  }
 0x22a   :  { %1741 = vsyncadd [#allocation5], 4294966784 }
 0x22b   :  { %1261 = vsyncpa [#allocation4], 1 }
 0x22c   :  { %1262 = vsyncpa [#allocation5], 1 }

</bundles_post_ra>
